<compile_context>
chip_gen: v6e
topology: v6e:2x2x1
jax: 0.10.0
libtpu: 0.0.40
codegen_flags: <defaults>
</compile_context>

<pallas_src>
import jax
import jax.numpy as jnp
from jax import lax
from jax.experimental import pallas as pl
from jax.experimental.pallas import tpu as pltpu


_NEG_BIG = -1e30  # bias for padded vocab columns (exp() underflows to 0)


def _round_up(a, b):
    return (a + b - 1) // b * b


def _cdiv(a, b):
    return (a + b - 1) // b


def _default_vmem_budget_bytes():
    """VMEM budget with headroom; per-generation when the info is queryable."""
    try:
        info = pltpu.get_tpu_info()
        cap = getattr(info, "vmem_capacity_bytes", None)
        if cap:
            # ~80% of capacity: ~102 MiB on v5e/v6e (128 MiB), ~51 MiB on v7x.
            return int(min(max(int(cap) * 8 // 10, 32 << 20), 100 << 20))
    except Exception:
        pass
    # Conservative fallback that is safe on every generation (v7x: 64 MiB).
    return 48 << 20


# ---------------------------------------------------------------------------
# Kernel 1: resident-vocab single pass.
#   logits = x @ W^T + b accumulated over K tiles; log_softmax in the
#   finalize step (full padded vocab lives in the last block dim).
# ---------------------------------------------------------------------------
def _resident_vocab_kernel(x_ref, w_ref, b_ref, o_ref, acc_ref):
    k = pl.program_id(1)

    @pl.when(k == 0)
    def _():
        # Bias-initialized accumulator: no extra (TM, V) add in the epilogue.
        acc_ref[...] = jnp.broadcast_to(b_ref[...], acc_ref.shape)

    # bf16 MXU inputs, f32 accumulation (single-pass matmul).  The weight is
    # kept in its (vocab, d_model) layout; contract on both last dims.
    acc_ref[...] += lax.dot_general(
        x_ref[...].astype(jnp.bfloat16),
        w_ref[...].astype(jnp.bfloat16),
        dimension_numbers=(((1,), (1,)), ((), ())),
        preferred_element_type=jnp.float32,
    )

    @pl.when(k == pl.num_programs(1) - 1)
    def _():
        logits = acc_ref[...]
        m = jnp.max(logits, axis=-1, keepdims=True)
        shifted = logits - m
        lse = jnp.log(jnp.sum(jnp.exp(shifted), axis=-1, keepdims=True))
        o_ref[...] = (shifted - lse).astype(o_ref.dtype)


# ---------------------------------------------------------------------------
# Kernel 2a: vocab-tiled pass 1 -> f32 logit tiles + online logsumexp per row.
#   grid = (M tiles, V tiles, K tiles); K innermost, V next (running max/sum
#   scratch persists across the V axis for a fixed row tile).
# ---------------------------------------------------------------------------
def _vocab_tiled_logits_lse_kernel(x_ref, w_ref, b_ref, logits_ref, lse_ref,
                                   acc_ref, m_ref, l_ref):
    j = pl.program_id(1)
    k = pl.program_id(2)
    last_j = pl.num_programs(1) - 1
    last_k = pl.num_programs(2) - 1

    @pl.when(jnp.logical_and(j == 0, k == 0))
    def _():
        m_ref[...] = jnp.full(m_ref.shape, -jnp.inf, m_ref.dtype)
        l_ref[...] = jnp.zeros(l_ref.shape, l_ref.dtype)

    @pl.when(k == 0)
    def _():
        acc_ref[...] = jnp.broadcast_to(b_ref[...], acc_ref.shape)

    acc_ref[...] += lax.dot_general(
        x_ref[...].astype(jnp.bfloat16),
        w_ref[...].astype(jnp.bfloat16),
        dimension_numbers=(((1,), (1,)), ((), ())),
        preferred_element_type=jnp.float32,
    )

    @pl.when(k == last_k)
    def _():
        logits = acc_ref[...]
        logits_ref[...] = logits                       # f32 intermediate tile
        t_max = jnp.max(logits, axis=-1, keepdims=True)
        m_new = jnp.maximum(m_ref[...], t_max)
        l_ref[...] = (l_ref[...] * jnp.exp(m_ref[...] - m_new)
                      + jnp.sum(jnp.exp(logits - m_new), axis=-1, keepdims=True))
        m_ref[...] = m_new

    @pl.when(jnp.logical_and(k == last_k, j == last_j))
    def _():
        lse_ref[...] = m_ref[...] + jnp.log(l_ref[...])


# ---------------------------------------------------------------------------
# Kernel 2b: vocab-tiled pass 2 -> log-probs = logits - lse (lane-dense).
# ---------------------------------------------------------------------------
def _vocab_tiled_finalize_kernel(logits_ref, lse_ref, o_ref):
    o_ref[...] = (logits_ref[...] - lse_ref[...]).astype(o_ref.dtype)


# ---------------------------------------------------------------------------
# Wrapper: reproduces ProjectionLayer.forward
# ---------------------------------------------------------------------------
def projection_layer_forward(x, weight, bias, *, out_dtype=None,
                             vmem_budget_bytes=None, force_vocab_tiled=None,
                             tile_m=None, tile_v=None, tile_k=None,
                             prefer_multicore_split=True):
    """log_softmax(x @ weight.T + bias, axis=-1).

    x: (..., d_model); weight: (vocab, d_model) (nn.Linear layout); bias: (vocab,).
    """
    *lead, D = x.shape
    V, D_w = weight.shape
    assert D == D_w, f"d_model mismatch: x has {D}, weight has {D_w}"
    assert bias.shape == (V,)
    out_dtype = x.dtype if out_dtype is None else jnp.dtype(out_dtype)

    M = 1
    for s in lead:
        M *= s
    x2 = x.reshape(M, D)

    budget = (_default_vmem_budget_bytes() if vmem_budget_bytes is None
              else int(vmem_budget_bytes))

    # ---- vocab padding: lane-dense (multiple of 128); padded columns get a
    # very negative bias so they vanish from the logsumexp. -----------------
    V_pad = _round_up(V, 128)
    w = jnp.asarray(weight)
    b = jnp.asarray(bias).astype(jnp.float32)
    if V_pad != V:
        w = jnp.pad(w, ((0, V_pad - V), (0, 0)))
        b = jnp.pad(b, (0, V_pad - V), constant_values=_NEG_BIG)
    b = b.reshape(1, V_pad)

    # ---- reduction (d_model) tiling ----------------------------------------
    if tile_k is not None:
        TK = int(tile_k)
    elif D <= 2048:
        TK = D                        # single K step, no padding needed
    else:
        TK = 512                      # bounded weight tile -> pipelinable DMA
    D_pad = _round_up(D, TK)
    assert TK == D_pad or TK % 128 == 0, "tile_k must be a multiple of 128"
    if D_pad != D:
        x2 = jnp.pad(x2, ((0, 0), (0, D_pad - D)))
        w = jnp.pad(w, ((0, 0), (0, D_pad - D)))

    x_b = x2.dtype.itemsize
    w_b = w.dtype.itemsize
    o_b = out_dtype.itemsize
    rows8 = _round_up(max(M, 1), 8)
    margin = 1.25                     # headroom for compiler-internal scratch

    def est_resident(tm):
        # double-buffered x / W / bias tiles + out tile + f32 accumulator
        return (2 * tm * TK * x_b + 2 * V_pad * TK * w_b + 2 * V_pad * 4
                + 2 * tm * V_pad * o_b + tm * V_pad * 4)

    def est_tiled(tm, tv):
        pass1 = (2 * tm * TK * x_b + 2 * tv * TK * w_b + 2 * tv * 4
                 + 2 * tm * tv * 4 + 2 * tm * 4           # logits + lse outputs
                 + tm * tv * 4 + 2 * tm * 4)              # acc + m/l scratch
        pass2 = 2 * tm * tv * 4 + 2 * tm * 4 + 2 * tm * tv * o_b
        return max(pass1, pass2)

    # ---- row tile: target 256 (fills v6e/v7x MXU), avoid gross padding -----
    if tile_m is not None:
        TM = _round_up(int(tile_m), 8)
    else:
        TM = min(256, rows8)
        if (TM > 128 and _round_up(M, TM) - M >= 128
                and _round_up(M, 128) < _round_up(M, TM)):
            TM = 128
        # v7x has 2 TensorCores: give the "parallel" row axis >= 2 tiles when
        # the problem is big enough to amortize the extra weight re-stream.
        if prefer_multicore_split and M >= 256 and _cdiv(M, TM) == 1:
            TM = max(128, _round_up(_cdiv(TM, 2), 8))

    # ---- path selection -----------------------------------------------------
    if force_vocab_tiled is not None:
        use_resident = not force_vocab_tiled
    else:
        use_resident = est_resident(TM) * margin <= budget
        if (not use_resident and TM > 128
                and est_resident(128) * margin <= budget):
            TM, use_resident = 128, True

    TV = V_pad
    if not use_resident:
        if tile_v is not None:
            TV = int(tile_v)
            assert TV % 128 == 0 and V_pad % TV == 0
        else:
            TV = 128
            for cand in (2048, 1024, 512, 256):
                if V_pad % cand == 0 and est_tiled(TM, cand) * margin <= budget:
                    TV = cand
                    break
        while tile_m is None and TM > 8 and est_tiled(TM, TV) * margin > budget:
            TM = max(8, _round_up(_cdiv(TM, 2), 8))

    # ---- row padding so the grid divides evenly -----------------------------
    M_pad = _round_up(max(M, 1), TM)
    if M_pad != M:
        x2 = jnp.pad(x2, ((0, M_pad - M), (0, 0)))

    n_m, n_k = M_pad // TM, D_pad // TK
    est_used = est_resident(TM) if use_resident else est_tiled(TM, TV)
    vmem_limit = int(min(max(int(est_used * 2), 32 << 20),
                         max(budget, 32 << 20), 100 << 20))

    if use_resident:
        out = pl.pallas_call(
            _resident_vocab_kernel,
            out_shape=jax.ShapeDtypeStruct((M_pad, V_pad), out_dtype),
            grid=(n_m, n_k),
            in_specs=[
                pl.BlockSpec((TM, TK), lambda i, k: (i, k)),      # x rows
                pl.BlockSpec((V_pad, TK), lambda i, k: (0, k)),   # W (V, D) K-slice
                pl.BlockSpec((1, V_pad), lambda i, k: (0, 0)),    # bias (resident)
            ],
            out_specs=pl.BlockSpec((TM, V_pad), lambda i, k: (i, 0)),
            scratch_shapes=[pltpu.VMEM((TM, V_pad), jnp.float32)],
            compiler_params=pltpu.CompilerParams(
                dimension_semantics=("parallel", "arbitrary"),
                vmem_limit_bytes=vmem_limit,
            ),
        )(x2, w, b)
    else:
        n_v = V_pad // TV
        # Pass 1: logit tiles + online logsumexp per row.
        logits, lse = pl.pallas_call(
            _vocab_tiled_logits_lse_kernel,
            out_shape=(jax.ShapeDtypeStruct((M_pad, V_pad), jnp.float32),
                       jax.ShapeDtypeStruct((M_pad, 1), jnp.float32)),
            grid=(n_m, n_v, n_k),
            in_specs=[
                pl.BlockSpec((TM, TK), lambda i, j, k: (i, k)),   # x rows
                pl.BlockSpec((TV, TK), lambda i, j, k: (j, k)),   # W vocab/K tile
                pl.BlockSpec((1, TV), lambda i, j, k: (0, j)),    # bias vocab tile
            ],
            out_specs=(
                pl.BlockSpec((TM, TV), lambda i, j, k: (i, j)),
                pl.BlockSpec((TM, 1), lambda i, j, k: (i, 0)),
            ),
            scratch_shapes=[pltpu.VMEM((TM, TV), jnp.float32),
                            pltpu.VMEM((TM, 1), jnp.float32),
                            pltpu.VMEM((TM, 1), jnp.float32)],
            compiler_params=pltpu.CompilerParams(
                dimension_semantics=("parallel", "arbitrary", "arbitrary"),
                vmem_limit_bytes=vmem_limit,
            ),
        )(x2, w, b)
        # Pass 2: lane-dense elementwise normalize.
        out = pl.pallas_call(
            _vocab_tiled_finalize_kernel,
            out_shape=jax.ShapeDtypeStruct((M_pad, V_pad), out_dtype),
            grid=(n_m, n_v),
            in_specs=[
                pl.BlockSpec((TM, TV), lambda i, j: (i, j)),
                pl.BlockSpec((TM, 1), lambda i, j: (i, 0)),
            ],
            out_specs=pl.BlockSpec((TM, TV), lambda i, j: (i, j)),
            compiler_params=pltpu.CompilerParams(
                dimension_semantics=("parallel", "parallel"),
                vmem_limit_bytes=vmem_limit,
            ),
        )(logits, lse)

    return out[:M, :V].reshape(*lead, V)


# ---------------------------------------------------------------------------
# Demo / self-check
# ---------------------------------------------------------------------------
if __name__ == "__main__":
    key = jax.random.PRNGKey(0)

    def make_params(k, d_model, vocab):
        kw, kb = jax.random.split(k)
        bound = 1.0 / (d_model ** 0.5)
        w = jax.random.uniform(kw, (vocab, d_model), jnp.float32, -bound, bound)
        b = jax.random.uniform(kb, (vocab,), jnp.float32, -bound, bound)
        return w, b

    def reference(x, w, b):
        # Same numerics as the kernel: bf16 MXU inputs, f32 accumulation.
        logits = jnp.einsum(
            "...d,vd->...v", x.astype(jnp.bfloat16), w.astype(jnp.bfloat16),
            preferred_element_type=jnp.float32) + b.astype(jnp.float32)
        return jax.nn.log_softmax(logits, axis=-1)

    # --- Test 1: small shapes -> resident-vocab single-pass path -----------
    d_model, vocab, batch, seq = 32, 512, 2, 8
    k1, k2, key = jax.random.split(key, 3)
    x = jax.random.normal(k1, (batch, seq, d_model), jnp.float32)
    w, b = make_params(k2, d_model, vocab)
    out = jax.block_until_ready(projection_layer_forward(x, w, b))
    ref = reference(x, w, b)
    assert out.shape == (batch, seq, vocab) and out.dtype == x.dtype
    err = float(jnp.max(jnp.abs(out - ref)))
    assert err < 2e-3, f"resident path max_err={err}"

    # --- Test 2: vocab-tiled two-pass path (online logsumexp), exercising
    #             row / vocab / d_model padding and multi-tile K and V axes --
    d_model, vocab, batch, seq = 256, 1000, 2, 9     # M=18, V_pad=1024, 2 K steps
    k1, k2, key = jax.random.split(key, 3)
    x = jax.random.normal(k1, (batch, seq, d_model), jnp.float32)
    w, b = make_params(k2, d_model, vocab)
    out = jax.block_until_ready(
        projection_layer_forward(x, w, b, force_vocab_tiled=True,
                                 tile_v=256, tile_k=128))
    ref = reference(x, w, b)
    assert out.shape == (batch, seq, vocab) and out.dtype == x.dtype
    err = float(jnp.max(jnp.abs(out - ref)))
    assert err < 2e-3, f"vocab-tiled path max_err={err}"

    print("KERNEL_OK")
</pallas_src>

<mosaic_0001>
module attributes {stable_mosaic.version = 11 : i64} {
  func.func @_resident_vocab_kernel(%arg0: i32, %arg1: i32, %arg2: memref<16x32xf32, #tpu.memory_space<vmem>>, %arg3: memref<512x32xf32, #tpu.memory_space<vmem>>, %arg4: memref<1x512xf32, #tpu.memory_space<vmem>>, %arg5: memref<16x512xf32, #tpu.memory_space<vmem>>, %arg6: memref<16x512xf32, #tpu.memory_space<vmem>>) attributes {dimension_semantics = [#tpu.dimension_semantics<parallel>, #tpu.dimension_semantics<arbitrary>], iteration_bounds = array<i64: 1, 1>, scalar_prefetch = 0 : i64, scratch_operands = 1 : i64, tpu.core_type = #tpu.core_type<tc>, window_params = [{transform_indices = @transform_0, window_bounds = array<i64: 16, 32>}, {transform_indices = @transform_1, window_bounds = array<i64: 512, 32>}, {pipeline_mode = #tpu.pipeline_mode<synchronous>, transform_indices = @transform_2, window_bounds = array<i64: 1, 512>}, {transform_indices = @transform_3, window_bounds = array<i64: 16, 512>}]} {
    %c0_i32 = arith.constant 0 : i32
    %0 = arith.cmpi eq, %arg1, %c0_i32 : i32
    %1 = arith.extui %0 : i1 to i32
    %c0_i32_0 = arith.constant 0 : i32
    %2 = arith.cmpi ne, %1, %c0_i32_0 : i32
    scf.if %2 {
      %c0_10 = arith.constant 0 : index
      %c0_11 = arith.constant 0 : index
      %14 = vector.load %arg4[%c0_10, %c0_11] : memref<1x512xf32, #tpu.memory_space<vmem>>, vector<1x512xf32>
      %15 = vector.shape_cast %14 : vector<1x512xf32> to vector<1x512xf32>
      %16 = vector.broadcast %15 : vector<1x512xf32> to vector<16x512xf32>
      %c0_12 = arith.constant 0 : index
      %c0_13 = arith.constant 0 : index
      %17 = vector.load %arg6[%c0_12, %c0_13] : memref<16x512xf32, #tpu.memory_space<vmem>>, vector<16x512xf32>
      tpu.vector_store %arg6[%c0_12, %c0_13], %16 {strides = array<i32>} : memref<16x512xf32, #tpu.memory_space<vmem>>, vector<16x512xf32>,
    } else {
    }
    %c0 = arith.constant 0 : index
    %c0_1 = arith.constant 0 : index
    %3 = vector.load %arg6[%c0, %c0_1] : memref<16x512xf32, #tpu.memory_space<vmem>>, vector<16x512xf32>
    %c0_2 = arith.constant 0 : index
    %c0_3 = arith.constant 0 : index
    %4 = vector.load %arg2[%c0_2, %c0_3] : memref<16x32xf32, #tpu.memory_space<vmem>>, vector<16x32xf32>
    %5 = arith.truncf %4 : vector<16x32xf32> to vector<16x32xbf16>
    %c0_4 = arith.constant 0 : index
    %c0_5 = arith.constant 0 : index
    %6 = vector.load %arg3[%c0_4, %c0_5] : memref<512x32xf32, #tpu.memory_space<vmem>>, vector<512x32xf32>
    %7 = arith.truncf %6 : vector<512x32xf32> to vector<512x32xbf16>
    %cst = arith.constant dense<0.000000e+00> : vector<16x512xf32>
    %8 = tpu.matmul %5, %7, %cst {dimension_numbers = #tpu.dot_dimension_numbers<[1], [1], [0], [0], [0, 0, 1, 0], [], []>} : vector<16x32xbf16>, vector<512x32xbf16>, vector<16x512xf32> -> vector<16x512xf32>
    %9 = arith.addf %3, %8 : vector<16x512xf32>
    %c0_6 = arith.constant 0 : index
    %c0_7 = arith.constant 0 : index
    %10 = vector.load %arg6[%c0_6, %c0_7] : memref<16x512xf32, #tpu.memory_space<vmem>>, vector<16x512xf32>
    tpu.vector_store %arg6[%c0_6, %c0_7], %9 {strides = array<i32>} : memref<16x512xf32, #tpu.memory_space<vmem>>, vector<16x512xf32>,
    %c0_i32_8 = arith.constant 0 : i32
    %11 = arith.cmpi eq, %arg1, %c0_i32_8 : i32
    %12 = arith.extui %11 : i1 to i32
    %c0_i32_9 = arith.constant 0 : i32
    %13 = arith.cmpi ne, %12, %c0_i32_9 : i32
    scf.if %13 {
      %c0_10 = arith.constant 0 : index
      %c0_11 = arith.constant 0 : index
      %14 = vector.load %arg6[%c0_10, %c0_11] : memref<16x512xf32, #tpu.memory_space<vmem>>, vector<16x512xf32>
      %cst_12 = arith.constant dense<0xFF800000> : vector<16xf32>
      %15 = vector.multi_reduction <maximumf>, %14, %cst_12 [1] : vector<16x512xf32> to vector<16xf32>
      %16 = vector.shape_cast %15 : vector<16xf32> to vector<16x1xf32>
      %17 = vector.broadcast %16 : vector<16x1xf32> to vector<16x512xf32>
      %18 = arith.subf %14, %17 : vector<16x512xf32>
      %19 = math.exp %18 : vector<16x512xf32>
      %cst_13 = arith.constant dense<0.000000e+00> : vector<16xf32>
      %20 = vector.multi_reduction <add>, %19, %cst_13 [1] : vector<16x512xf32> to vector<16xf32>
      %21 = vector.shape_cast %20 : vector<16xf32> to vector<16x1xf32>
      %22 = math.log %21 : vector<16x1xf32>
      %23 = vector.broadcast %22 : vector<16x1xf32> to vector<16x512xf32>
      %24 = arith.subf %18, %23 : vector<16x512xf32>
      %c0_14 = arith.constant 0 : index
      %c0_15 = arith.constant 0 : index
      %25 = vector.load %arg5[%c0_14, %c0_15] : memref<16x512xf32, #tpu.memory_space<vmem>>, vector<16x512xf32>
      tpu.vector_store %arg5[%c0_14, %c0_15], %24 {strides = array<i32>} : memref<16x512xf32, #tpu.memory_space<vmem>>, vector<16x512xf32>,
    } else {
    }
    return
  }
  func.func @transform_0(%arg0: i32, %arg1: i32) -> (i32, i32) {
    %c0_i32 = arith.constant 0 : i32
    return %arg0, %arg1 : i32, i32
  }
  func.func @transform_1(%arg0: i32, %arg1: i32) -> (i32, i32) {
    %c0_i32 = arith.constant 0 : i32
    %c0_i32_0 = arith.constant 0 : i32
    return %c0_i32, %arg1 : i32, i32
  }
  func.func @transform_2(%arg0: i32, %arg1: i32) -> (i32, i32) {
    %c0_i32 = arith.constant 0 : i32
    %c0_i32_0 = arith.constant 0 : i32
    %c0_i32_1 = arith.constant 0 : i32
    return %c0_i32, %c0_i32_0 : i32, i32
  }
  func.func @transform_3(%arg0: i32, %arg1: i32) -> (i32, i32) {
    %c0_i32 = arith.constant 0 : i32
    %c0_i32_0 = arith.constant 0 : i32
    return %arg0, %c0_i32 : i32, i32
  }
}

</mosaic_0001>

<bundles_post_ra>
// kernel: tpu_custom_call.1
= control target key start
LH: loop header
LB: loop body
LE: loop exit
PB: predicated region body
PF: predicated region fallthrough
CT: control target
= control target key end

     0   :  { %vm157_vm0 = vcmask 261120   ;;  %s818_s0 = inlined_call_operand.vmem [shape: f32[16,32], index: 0, kind: input, shape index: {}]   ;;  %s819_s1 = inlined_call_operand.vmem [shape: f32[512,32], index: 1, kind: input, shape index: {}]   ;;  %s820_s2 = inlined_call_operand.vmem [shape: f32[1,512], index: 2, kind: input, shape index: {}]   ;;  %s821_s3 = inlined_call_operand.hbm [shape: f32[16,512], index: 3, kind: output, shape index: {}]  }
   0x1   :  { %v91_v0 = vld [vmem:[%s819_s1 + $0xf0] sm:$0xff]  ;;  %v92_v1 = vld [vmem:[%s819_s1 + $0xf8] sm:$0xff]  ;;  %v89_v11 = vld [vmem:[%s819_s1 + $0xe0] sm:$0xff] }
   0x2   :  { %v123_v2 = vld [vmem:[%s819_s1 + $0x1f0] sm:$0xff]  ;;  %v140_v3 = vpack.c.bf16 %v92_v1, %v91_v0  ;;  %v124_v4 = vld [vmem:[%s819_s1 + $0x1f8] sm:$0xff]  ;;  %v90_v13 = vld [vmem:[%s819_s1 + $0xe8] sm:$0xff] }
   0x3   :  { %v75_v5 = vld [vmem:[%s819_s1 + $0x70] sm:$0xff]  ;;  %v76_v6 = vld [vmem:[%s819_s1 + $0x78] sm:$0xff]  ;;  %v156_v7 = vpack.c.bf16 %v124_v4, %v123_v2  ;;  %v121_v14 = vld [vmem:[%s819_s1 + $0x1e0] sm:$0xff]  ;;  %v139_v17 = vpack.c.bf16 %v90_v13, %v89_v11 }
   0x4   :  { %v132_v8 = vpack.c.bf16 %v76_v6, %v75_v5  ;;  %v107_v9 = vld [vmem:[%s819_s1 + $0x170] sm:$0xff]  ;;  %v108_v10 = vld [vmem:[%s819_s1 + $0x178] sm:$0xff]  ;;  %488 = vmatprep.subr.msk.bf16.mxu0 %vm157_vm0, %v140_v3  ;;  %v122_v15 = vld [vmem:[%s819_s1 + $0x1e8] sm:$0xff] }
   0x5   :  { %v148_v12 = vpack.c.bf16 %v108_v10, %v107_v9  ;;  %496 = vmatprep.subr.msk.bf16.mxu1 %vm157_vm0, %v156_v7  ;;  %v155_v18 = vpack.c.bf16 %v122_v15, %v121_v14  ;;  %v73_v19 = vld [vmem:[%s819_s1 + $0x60] sm:$0xff]  ;;  %v74_v20 = vld [vmem:[%s819_s1 + $0x68] sm:$0xff]  ;;  %v87_v26 = vld [vmem:[%s819_s1 + $0xd0] sm:$0xff] }
   0x6   :  { %v183_v16 = vsel %vm157_vm0, %v132_v8, 0  ;;  %v105_v21 = vld [vmem:[%s819_s1 + $0x160] sm:$0xff]  ;;  %v106_v23 = vld [vmem:[%s819_s1 + $0x168] sm:$0xff]  ;;  %v131_v24 = vpack.c.bf16 %v74_v20, %v73_v19  ;;  %v88_v27 = vld [vmem:[%s819_s1 + $0xd8] sm:$0xff] }
   0x7   :  { %453 = vmatpush3.bf16.xpose.msra.mxu0 %v183_v16  ;;  %v231_v22 = vsel %vm157_vm0, %v148_v12, 0  ;;  %v147_v25 = vpack.c.bf16 %v106_v23, %v105_v21  ;;  %v119_v28 = vld [vmem:[%s819_s1 + $0x1d0] sm:$0xff]  ;;  %v120_v29 = vld [vmem:[%s819_s1 + $0x1d8] sm:$0xff]  ;;  %v138_v31 = vpack.c.bf16 %v88_v27, %v87_v26  ;;  %v85_v40 = vld [vmem:[%s819_s1 + $0xc0] sm:$0xff] }
   0x8   :  { %471 = vmatpush3.bf16.xpose.msra.mxu1 %v231_v22  ;;  %489 = vmatprep.subr.msk.bf16.mxu0 %vm157_vm0, %v139_v17  ;;  %v180_v30 = vsel %vm157_vm0, %v131_v24, 0  ;;  %v154_v33 = vpack.c.bf16 %v120_v29, %v119_v28  ;;  %v71_v34 = vld [vmem:[%s819_s1 + $0x50] sm:$0xff]  ;;  %v72_v35 = vld [vmem:[%s819_s1 + $0x58] sm:$0xff]  ;;  %v86_v41 = vld [vmem:[%s819_s1 + $0xc8] sm:$0xff] }
   0x9   :  { %497 = vmatprep.subr.msk.bf16.mxu1 %vm157_vm0, %v155_v18  ;;  %v228_v32 = vsel %vm157_vm0, %v147_v25, 0  ;;  %v103_v36 = vld [vmem:[%s819_s1 + $0x150] sm:$0xff]  ;;  %v104_v37 = vld [vmem:[%s819_s1 + $0x158] sm:$0xff]  ;;  %v130_v38 = vpack.c.bf16 %v72_v35, %v71_v34  ;;  %v117_v42 = vld [vmem:[%s819_s1 + $0x1c0] sm:$0xff]  ;;  %v137_v45 = vpack.c.bf16 %v86_v41, %v85_v40 }
   0xa   :  { %v146_v39 = vpack.c.bf16 %v104_v37, %v103_v36  ;;  %v118_v43 = vld [vmem:[%s819_s1 + $0x1c8] sm:$0xff]  ;;  %v69_v48 = vld [vmem:[%s819_s1 + $0x40] sm:$0xff] }
   0xb   :  { %v177_v44 = vsel %vm157_vm0, %v130_v38, 0  ;;  %v153_v47 = vpack.c.bf16 %v118_v43, %v117_v42  ;;  %v70_v49 = vld [vmem:[%s819_s1 + $0x48] sm:$0xff]  ;;  %v101_v50 = vld [vmem:[%s819_s1 + $0x140] sm:$0xff] }
   0xc   :  { %v225_v46 = vsel %vm157_vm0, %v146_v39, 0  ;;  %v102_v51 = vld [vmem:[%s819_s1 + $0x148] sm:$0xff]  ;;  %v58_v52 = vld [vmem:[%s818_s0] sm:$0xff]  ;;  %v129_v54 = vpack.c.bf16 %v70_v49, %v69_v48 }
   0xd   :  { %v59_v53 = vld [vmem:[%s818_s0 + $0x8] sm:$0xff] }
   0xe   :  { %v687_v55 = vpack.c.bf16 %v59_v53, %v58_v52 }
   0xf   :  { %455 = vmatpush3.bf16.xpose.msra.mxu0 %v180_v30 }
  0x10   :  { %473 = vmatpush3.bf16.xpose.msra.mxu1 %v228_v32  ;;  %490 = vmatprep.subr.msk.bf16.mxu0 %vm157_vm0, %v138_v31 }
  0x11   :  { %498 = vmatprep.subr.msk.bf16.mxu1 %vm157_vm0, %v154_v33 }
  0x17   :  { %457 = vmatpush3.bf16.xpose.msra.mxu0 %v177_v44 }
  0x18   :  { %475 = vmatpush3.bf16.xpose.msra.mxu1 %v225_v46  ;;  %491 = vmatprep.subr.msk.bf16.mxu0 %vm157_vm0, %v137_v45 }
  0x19   :  { %8 = vsyncpa [#allocation4], 0  ;;  %499 = vmatprep.subr.msk.bf16.mxu1 %vm157_vm0, %v153_v47  ;;  %v145_v56 = vpack.c.bf16 %v102_v51, %v101_v50  ;;  %v83_v57 = vld [vmem:[%s819_s1 + $0xb0] sm:$0xff]  ;;  %v84_v58 = vld [vmem:[%s819_s1 + $0xb8] sm:$0xff]  ;;  %468 = vmatprep.mubr.msk.bf16.mxu0 %vm157_vm0, %v687_v55  ;;  %v174_v61 = vsel %vm157_vm0, %v129_v54, 0  ;;  %v22_v51 = vlaneseq }
  0x1a   :  { %v115_v59 = vld [vmem:[%s819_s1 + $0x1b0] sm:$0xff]  ;;  %v116_v60 = vld [vmem:[%s819_s1 + $0x1b8] sm:$0xff]  ;;  %486 = vmatprep.mubr.msk.bf16.mxu1 %vm157_vm0, %v687_v55  ;;  %v136_v62 = vpack.c.bf16 %v84_v58, %v83_v57  ;;  %v81_v7 = vld [vmem:[%s819_s1 + $0xa0] sm:$0xff] }
  0x1b   :  { %v222_v63 = vsel %vm157_vm0, %v145_v56, 0  ;;  %v152_v0 = vpack.c.bf16 %v116_v60, %v115_v59  ;;  %v67_v1 = vld [vmem:[%s819_s1 + $0x30] sm:$0xff]  ;;  %v68_v2 = vld [vmem:[%s819_s1 + $0x38] sm:$0xff]  ;;  %v82_v8 = vld [vmem:[%s819_s1 + $0xa8] sm:$0xff]  ;;  %v23_v52 = vshrl.u32 %v22_v51, 7 }
  0x1c   :  { %v99_v3 = vld [vmem:[%s819_s1 + $0x130] sm:$0xff]  ;;  %v100_v4 = vld [vmem:[%s819_s1 + $0x138] sm:$0xff]  ;;  %v128_v5 = vpack.c.bf16 %v68_v2, %v67_v1  ;;  %v113_v9 = vld [vmem:[%s819_s1 + $0x1a0] sm:$0xff]  ;;  %v135_v12 = vpack.c.bf16 %v82_v8, %v81_v7 }
  0x1d   :  { %v144_v6 = vpack.c.bf16 %v100_v4, %v99_v3  ;;  %v114_v10 = vld [vmem:[%s819_s1 + $0x1a8] sm:$0xff]  ;;  %v65_v15 = vld [vmem:[%s819_s1 + $0x20] sm:$0xff]  ;;  %v79_v21 = vld [vmem:[%s819_s1 + $0x90] sm:$0xff]  ;;  %v24_v53 = vsub.s32 0, %v23_v52  ;;  %v32_v54 = vsub.s32 2, %v23_v52  ;;  %v28_v57 = vsub.s32 1, %v23_v52 }
  0x1e   :  { %v171_v11 = vsel %vm157_vm0, %v128_v5, 0  ;;  %v151_v14 = vpack.c.bf16 %v114_v10, %v113_v9  ;;  %v66_v16 = vld [vmem:[%s819_s1 + $0x28] sm:$0xff]  ;;  %v97_v17 = vld [vmem:[%s819_s1 + $0x120] sm:$0xff]  ;;  %v80_v22 = vld [vmem:[%s819_s1 + $0x98] sm:$0xff]  ;;  %v36_v58 = vsub.s32 3, %v23_v52 }
  0x1f   :  { %459 = vmatpush3.bf16.xpose.msra.mxu0 %v174_v61  ;;  %v219_v13 = vsel %vm157_vm0, %v144_v6, 0  ;;  %v98_v18 = vld [vmem:[%s819_s1 + $0x128] sm:$0xff]  ;;  %v127_v19 = vpack.c.bf16 %v66_v16, %v65_v15  ;;  %v111_v23 = vld [vmem:[%s819_s1 + $0x190] sm:$0xff]  ;;  %v112_v24 = vld [vmem:[%s819_s1 + $0x198] sm:$0xff]  ;;  %v134_v26 = vpack.c.bf16 %v80_v22, %v79_v21 }
  0x20   :  { %477 = vmatpush3.bf16.xpose.msra.mxu1 %v222_v63  ;;  %492 = vmatprep.subr.msk.bf16.mxu0 %vm157_vm0, %v136_v62  ;;  %v143_v20 = vpack.c.bf16 %v98_v18, %v97_v17  ;;  %v150_v28 = vpack.c.bf16 %v112_v24, %v111_v23  ;;  %v63_v29 = vld [vmem:[%s819_s1 + $0x10] sm:$0xff]  ;;  %v64_v30 = vld [vmem:[%s819_s1 + $0x18] sm:$0xff]  ;;  %v77_v35 = vld [vmem:[%s819_s1 + $0x80] sm:$0xff] }
  0x21   :  { %500 = vmatprep.subr.msk.bf16.mxu1 %vm157_vm0, %v152_v0  ;;  %v168_v25 = vsel %vm157_vm0, %v127_v19, 0  ;;  %v95_v31 = vld [vmem:[%s819_s1 + $0x110] sm:$0xff]  ;;  %v96_v32 = vld [vmem:[%s819_s1 + $0x118] sm:$0xff]  ;;  %v126_v33 = vpack.c.bf16 %v64_v30, %v63_v29  ;;  %v78_v36 = vld [vmem:[%s819_s1 + $0x88] sm:$0xff] }
  0x22   :  { %v216_v27 = vsel %vm157_vm0, %v143_v20, 0  ;;  %v142_v34 = vpack.c.bf16 %v96_v32, %v95_v31  ;;  %v109_v37 = vld [vmem:[%s819_s1 + $0x180] sm:$0xff]  ;;  %v110_v38 = vld [vmem:[%s819_s1 + $0x188] sm:$0xff]  ;;  %v133_v40 = vpack.c.bf16 %v78_v36, %v77_v35 }
  0x23   :  { %v165_v39 = vsel %vm157_vm0, %v126_v33, 0  ;;  %v149_v42 = vpack.c.bf16 %v110_v38, %v109_v37  ;;  %v61_v43 = vld [vmem:[%s819_s1] sm:$0xff]  ;;  %v62_v44 = vld [vmem:[%s819_s1 + $0x8] sm:$0xff] }
  0x24   :  { %v213_v41 = vsel %vm157_vm0, %v142_v34, 0  ;;  %v93_v45 = vld [vmem:[%s819_s1 + $0x100] sm:$0xff]  ;;  %v94_v46 = vld [vmem:[%s819_s1 + $0x108] sm:$0xff]  ;;  %v125_v47 = vpack.c.bf16 %v62_v44, %v61_v43 }
  0x25   :  { %v141_v48 = vpack.c.bf16 %v94_v46, %v93_v45  ;;  %v20_v56 = vld [vmem:[%s820_s2] sm:$0xf]  ;;  %s549_s2 = smov [#allocation3]  }
  0x26   :  { %v162_v49 = vsel %vm157_vm0, %v125_v47, 0  ;;  %v25_v59 = vrot.slane %v20_v56, %v24_v53  ;;  %v33_v60 = vrot.slane %v20_v56, %v32_v54  ;;  %v29_v61 = vrot.slane %v20_v56, %v28_v57  ;;  %s439_s7 = sshll.u32 %s549_s2, 4  ;;  %s440_s7 = int_to_ptr.vmem [resolvable:$true] %s439_s7 }
  0x27   :  { %461 = vmatpush3.bf16.xpose.msra.mxu0 %v171_v11  ;;  %v210_v50 = vsel %vm157_vm0, %v141_v48, 0  ;;  %v37_v63 = vrot.slane %v20_v56, %v36_v58  ;;  %s527_s8 = scalar_lea.vmem %s440_s7, 1024  ;;  %p532_p1 = scmp.lt.s32.totalorder %s440_s7, %s440_s7 }
  0x28   :  { %479 = vmatpush3.bf16.xpose.msra.mxu1 %v219_v13  ;;  %493 = vmatprep.subr.msk.bf16.mxu0 %vm157_vm0, %v135_v12  ;;  %p528_p0 = scmp.ne.s32.totalorder %s440_s7, %s527_s8  ;;  %p533_p2 = scmp.lt.s32.totalorder %s527_s8, %s527_s8 }
  0x29   :  { %501 = vmatprep.subr.msk.bf16.mxu1 %vm157_vm0, %v151_v14 }
  0x2a   :  { %p534_p3 = por %p533_p2, %p532_p1 }
  0x2c   :  { %p535_p4 = pnand %p534_p3, %p528_p0 }
  0x2f   :  { %463 = vmatpush3.bf16.xpose.msra.mxu0 %v168_v25 }
  0x30   :  { %481 = vmatpush3.bf16.xpose.msra.mxu1 %v216_v27  ;;  %494 = vmatprep.subr.msk.bf16.mxu0 %vm157_vm0, %v134_v26 }
  0x31   :  { %502 = vmatprep.subr.msk.bf16.mxu1 %vm157_vm0, %v150_v28 }
  0x37   :  { %465 = vmatpush3.bf16.xpose.msra.mxu0 %v165_v39 }
  0x38   :  { %483 = vmatpush3.bf16.xpose.msra.mxu1 %v213_v41  ;;  %495 = vmatprep.subr.msk.bf16.mxu0 %vm157_vm0, %v133_v40 }
  0x39   :  { %503 = vmatprep.subr.msk.bf16.mxu1 %vm157_vm0, %v149_v42 }
  0x3f   :  { %467 = vmatpush3.bf16.xpose.msra.mxu0 %v162_v49 }
  0x40   :  { %485 = vmatpush3.bf16.xpose.msra.mxu1 %v210_v50 }
  0x46   :  { %469 = vmatmul.mubr.msk.bf16.vlgmr.msra.gmra.mxu0 %vm157_vm0, %v687_v55 }
  0x47   :  { %487 = vmatmul.mubr.msk.bf16.vlgmr.msra.gmra.mxu1 %vm157_vm0, %v687_v55 }
 0x106   :  { %v291_v62 = vpop.f32.mrf.mxu0 }
 0x107   :  { %v334_v0 = vpop.f32.mrf.mxu1  ;;  %v343_v1 = vadd.f32 %v291_v62, %v25_v59 }
 0x108   :  { %v345_v2 = vadd.f32 %v334_v0, %v33_v60  ;;  %v293_v3 = vpop.f32.mrf.mxu0 }
 0x109   :  { %v344_v55 = vadd.f32 %v293_v3, %v29_v61  ;;  %v336_v4 = vpop.f32.mrf.mxu1 }
 0x10a   :  { %v346_v5 = vadd.f32 %v336_v4, %v37_v63  ;;  %v295_v6 = vpop.f32.mrf.mxu0  ;;  %v370_v11 = vmax.f32 %v343_v1, %v345_v2 }
 0x10b   :  { %v338_v7 = vpop.f32.mrf.mxu1  ;;  %v347_v8 = vadd.f32 %v295_v6, %v25_v59 }
 0x10c   :  { %v349_v9 = vadd.f32 %v338_v7, %v33_v60  ;;  %v297_v10 = vpop.f32.mrf.mxu0  ;;  %v371_v12 = vmax.f32 %v344_v55, %v346_v5 }
 0x10d   :  { %v348_v13 = vadd.f32 %v297_v10, %v29_v61  ;;  %v340_v14 = vpop.f32.mrf.mxu1 }
 0x10e   :  { %v350_v15 = vadd.f32 %v340_v14, %v37_v63  ;;  %v372_v16 = vmax.f32 %v370_v11, %v371_v12  ;;  %v375_v17 = vmax.f32 %v347_v8, %v349_v9 }
 0x110   :  { %v376_v18 = vmax.f32 %v348_v13, %v350_v15  ;;  %373 = vmax.xlane.f32.xlu0 %v372_v16 }
 0x112   :  { %v377_v19 = vmax.f32 %v375_v17, %v376_v18 }
 0x114   :  { %378 = vmax.xlane.f32.xlu0 %v377_v19 }
 0x199   :  { %v374_v20 = vpop.xlane.xlu0 %373 }
 0x19a   :  { %v380_v21 = vsub.f32 %v343_v1, %v374_v20  ;;  %v381_v22 = vsub.f32 %v344_v55, %v374_v20  ;;  %v382_v23 = vsub.f32 %v345_v2, %v374_v20  ;;  %v383_v24 = vsub.f32 %v346_v5, %v374_v20 }
 0x19c   :  { %v388_v25 = vmul.f32 1.442695, %v380_v21  ;;  %v390_v26 = vmul.f32 1.442695, %v381_v22  ;;  %v392_v27 = vmul.f32 1.442695, %v382_v23 }
 0x19d   :  { %v394_v28 = vmul.f32 1.442695, %v383_v24  ;;  %v379_v29 = vpop.xlane.xlu0 %378 }
 0x19e   :  { %507 = vpow2.f32 %v388_v25  ;;  %v384_v30 = vsub.f32 %v347_v8, %v379_v29  ;;  %v385_v31 = vsub.f32 %v348_v13, %v379_v29  ;;  %v386_v32 = vsub.f32 %v349_v9, %v379_v29 }
 0x19f   :  { %509 = vpow2.f32 %v390_v26  ;;  %v387_v33 = vsub.f32 %v350_v15, %v379_v29 }
 0x1a0   :  { %511 = vpow2.f32 %v392_v27  ;;  %v396_v34 = vmul.f32 1.442695, %v384_v30  ;;  %v398_v35 = vmul.f32 1.442695, %v385_v31  ;;  %v400_v36 = vmul.f32 1.442695, %v386_v32 }
 0x1a1   :  { %513 = vpow2.f32 %v394_v28  ;;  %v402_v37 = vmul.f32 1.442695, %v387_v33 }
 0x1a2   :  { %515 = vpow2.f32 %v396_v34 }
 0x1a3   :  { %517 = vpow2.f32 %v398_v35 }
 0x1a4   :  { %519 = vpow2.f32 %v400_v36 }
 0x1a5   :  { %521 = vpow2.f32 %v402_v37 }
 0x1ab   :  { %v508_v38 = vpop.eup %507 }
 0x1ac   :  { %v510_v39 = vpop.eup %509 }
 0x1ad   :  { %v512_v40 = vpop.eup %511  ;;  %v404_v41 = vadd.f32 %v510_v39, %v508_v38 }
 0x1ae   :  { %v514_v42 = vpop.eup %513 }
 0x1af   :  { %v516_v43 = vpop.eup %515  ;;  %v405_v44 = vadd.f32 %v512_v40, %v404_v41 }
 0x1b0   :  { %v518_v45 = vpop.eup %517 }
 0x1b1   :  { %v406_v46 = vadd.f32 %v514_v42, %v405_v44  ;;  %v409_v47 = vadd.f32 %v518_v45, %v516_v43  ;;  %v520_v48 = vpop.eup %519 }
 0x1b2   :  { %v522_v50 = vpop.eup %521 }
 0x1b3   :  { %407 = vadd.xlane.f32.xlu1 %v406_v46  ;;  %v410_v49 = vadd.f32 %v520_v48, %v409_v47 }
 0x1b5   :  { %v411_v51 = vadd.f32 %v522_v50, %v410_v49 }
 0x1b7   :  { %412 = vadd.xlane.f32.xlu1 %v411_v51 }
 0x23c   :  { %v408_v52 = vpop.xlane.xlu1 %407 }
 0x23d   :  { %523 = vlog2.f32 %v408_v52 }
 0x240   :  { %v413_v53 = vpop.xlane.xlu1 %412 }
 0x241   :  { %525 = vlog2.f32 %v413_v53 }
 0x24a   :  { %v524_v54 = vpop.eup %523 }
 0x24b   :  { %v415_v56 = vmul.f32 0.6931472, %v524_v54 }
 0x24d   :  { %v418_v57 = vsub.f32 %v380_v21, %v415_v56  ;;  %v419_v58 = vsub.f32 %v381_v22, %v415_v56  ;;  %v420_v59 = vsub.f32 %v382_v23, %v415_v56  ;;  %v421_v60 = vsub.f32 %v383_v24, %v415_v56 }
 0x24e   :  { %v526_v61 = vpop.eup %525 }
 0x24f   :  { %426 = vst [vmem:[#allocation3] sm:$0xff] %v418_v57  ;;  %427 = vst [vmem:[#allocation3 + $0x8] sm:$0xff] %v419_v58  ;;  %v417_v62 = vmul.f32 0.6931472, %v526_v61 }
 0x250   :  { %428 = vst [vmem:[#allocation3 + $0x10] sm:$0xff] %v420_v59  ;;  %429 = vst [vmem:[#allocation3 + $0x18] sm:$0xff] %v421_v60 }
 0x251   :  { %v422_v63 = vsub.f32 %v384_v30, %v417_v62  ;;  %v423_v0 = vsub.f32 %v385_v31, %v417_v62  ;;  %v424_v1 = vsub.f32 %v386_v32, %v417_v62  ;;  %v425_v2 = vsub.f32 %v387_v33, %v417_v62 }
 0x253   :  { %430 = vst [vmem:[#allocation3 + $0x20] sm:$0xff] %v422_v63  ;;  %431 = vst [vmem:[#allocation3 + $0x28] sm:$0xff] %v423_v0 }
 0x254   :  { %432 = vst [vmem:[#allocation3 + $0x30] sm:$0xff] %v424_v1  ;;  %433 = vst [vmem:[#allocation3 + $0x38] sm:$0xff] %v425_v2 }
 0x255   :  { %538 = shalt.err (!%p535_p4)
}
 0x256   :  { %s550_s9 = smov 512   ;;  %s551_s10 = smov 32  }
 0x257   :  { %445 = dma.vmem_to_hbm [thread:$0]  %s440_s7, 1024, %s821_s3, [#allocation4], %s550_s9, %s550_s9, %s551_s10  }
 0x258   :  { %547 = dma.done.wait [#allocation4], 1024  }
 0x259   :  { %548 = vsyncadd [#allocation4], 4294966272 }
 0x25a   :  { %449 = vsyncpa [#allocation4], 1 }

</bundles_post_ra>
